<compile_context>
chip_gen: v7x
topology: tpu7x:2x2x1
jax: 0.10.0
libtpu: 0.0.40
codegen_flags: <defaults>
</compile_context>

<pallas_src>
import jax
import jax.numpy as jnp
from jax.experimental import pallas as pl
from jax.experimental.pallas import tpu as pltpu


# ---------------------------------------------------------------------------
# Fused kernel: for one row tile,  out_rows = bf16(x_rows) @ W_total + b_total
#   x_ref : (TILE_M, F)   native input dtype (f32 or bf16), F = bps*2*(1+cse)
#   w_ref : (F, latent)   bf16 folded weight (VMEM-resident across grid steps)
#   b_ref : (1, latent)   f32 folded bias
#   o_ref : (TILE_M, latent) f32
# ---------------------------------------------------------------------------
def _fused_rows_kernel(x_ref, w_ref, b_ref, o_ref):
    a = x_ref[...].astype(jnp.bfloat16)           # VPU cast; single-pass bf16 MXU
    acc = jnp.dot(a, w_ref[...], preferred_element_type=jnp.float32)
    o_ref[...] = (acc + b_ref[...]).astype(o_ref.dtype)


def _choose_tile_m(rows, feat, x_itemsize, vmem_budget_bytes=12 << 20):
    """Row-tile size: multiple of 8, double-buffered x slab within a VMEM budget
    that is comfortable on every generation (incl. v7x's 64 MiB)."""
    per_row = feat * x_itemsize
    cap = max(8, min(1024, (vmem_budget_bytes // (2 * per_row)) // 8 * 8))
    if rows <= cap:
        return rows          # single grid step; full-dim block satisfies (8,128) rule
    return cap               # multiple of 8; ragged final block handled by Pallas


def fold_params(params, *, bps_dim, cse_dim, latent_dim):
    """One-time (parameter-load-time) weight folding.

    Folds contactMapEmb, corrMapEmb, the per-hand concat and the
    view(seq, bs, bps*cse) into bimanualEmb, producing a single affine map
        out_row = x_row @ W_total + b_total,
    where x_row = x[b, s].reshape(bps*2*(1+cse)) in natural memory order
    (feature index = (p*2+h)*(1+cse) + j = g*(1+cse)+j).
    Folding is done in f32 (exact re-association); only the final weight is
    cast to bf16 so quantization error is not compounded through the fold.
    """
    hd = cse_dim // 2
    Wc = params["Wc"].astype(jnp.float32)      # (1, 1)
    bc = params["bc"].astype(jnp.float32)      # (1,)
    We = params["We"].astype(jnp.float32)      # (hd-1, cse)
    be = params["be"].astype(jnp.float32)      # (hd-1,)
    Wbig = params["Wbig"].astype(jnp.float32)  # (latent, bps*cse)
    bbig = params["bbig"].astype(jnp.float32)  # (latent,)

    # Per-(bps point, hand) embedding as one (1+cse) -> hd affine map:
    #   column 0 = contact embedding, columns 1.. = correspondence embedding.
    Wemb = jnp.zeros((1 + cse_dim, hd), jnp.float32)
    Wemb = Wemb.at[0, 0].set(Wc[0, 0])
    Wemb = Wemb.at[1:, 1:].set(We.T)
    bemb = jnp.concatenate([bc, be], axis=0)                       # (hd,)

    # bimanualEmb consumes features in order f = p*cse + h*hd + k = g*hd + k
    # with g = p*2 + h  (== torch.cat((x1, x2), -1).view(seq, bs, -1)).
    WbigR = Wbig.reshape(latent_dim, bps_dim * 2, hd)              # (l, g, k)
    W_total = jnp.einsum("jk,lgk->gjl", Wemb, WbigR,
                         precision=jax.lax.Precision.HIGHEST)      # (g, 1+cse, l)
    W_total = W_total.reshape(bps_dim * 2 * (1 + cse_dim), latent_dim)
    b_total = bbig + jnp.einsum("k,lgk->l", bemb, WbigR,
                                precision=jax.lax.Precision.HIGHEST)
    # bf16 weight: halves the dominant HBM stream; bias stays f32 (added after
    # the f32 accumulation, negligible bytes).
    return W_total.astype(jnp.bfloat16), b_total.reshape(1, latent_dim)


def input_process_cemap(x, w_total, b_total):
    """Forward pass of InputProcess_CEMap using the folded parameters.

    x: (bs, seq, bps, 2, 1+cse)  ->  (seq, bs, latent), f32.
    """
    bs, seqlen, bps, nhand, icse = x.shape
    assert nhand == 2, f"expected 2 hands, got {nhand}"
    feat = bps * 2 * icse
    assert w_total.shape[0] == feat, (w_total.shape, feat)
    latent = w_total.shape[1]

    rows = bs * seqlen
    # Free reshape: collapse trailing dims, rows stay in (b, s) order; x keeps
    # its native dtype (no wrapper-side astype / extra HBM copy).
    x2d = x.reshape(rows, feat)

    tile_m = _choose_tile_m(rows, feat, x2d.dtype.itemsize)
    grid = (pl.cdiv(rows, tile_m),)    # (1,) at the test shape -> single step

    out = pl.pallas_call(
        _fused_rows_kernel,
        out_shape=jax.ShapeDtypeStruct((rows, latent), jnp.float32),
        grid=grid,
        in_specs=[
            pl.BlockSpec((tile_m, feat), lambda i: (i, 0)),
            pl.BlockSpec((feat, latent), lambda i: (0, 0)),   # weight VMEM-resident
            pl.BlockSpec((1, latent), lambda i: (0, 0)),
        ],
        out_specs=pl.BlockSpec((tile_m, latent), lambda i: (i, 0)),
        compiler_params=pltpu.CompilerParams(
            dimension_semantics=("parallel",)),
    )(x2d, w_total, b_total)

    # (bs*seq, latent) -> (seq, bs, latent). ~2 KiB at the test shape; under jit
    # this compiles into the same executable as the pallas_call (and in a real
    # model it fuses into the downstream consumer).
    return jnp.swapaxes(out.reshape(bs, seqlen, latent), 0, 1)


def reference(x, params):
    """Pure-JAX, un-fused reimplementation of the PyTorch forward (f32)."""
    Wc, bc = params["Wc"], params["bc"]
    We, be = params["We"], params["be"]
    Wbig, bbig = params["Wbig"], params["bbig"]
    hi = jax.lax.Precision.HIGHEST
    xp = jnp.transpose(x, (1, 0, 2, 3, 4))          # (seq, bs, bps, 2, 1+cse)

    def emb_hand(xh):
        c = xh[..., 0:1] * Wc[0, 0] + bc[0]
        e = jnp.einsum("sbpj,kj->sbpk", xh[..., 1:], We, precision=hi) + be
        return jnp.concatenate([c, e], axis=-1)

    h1 = emb_hand(xp[:, :, :, 0, :])
    h2 = emb_hand(xp[:, :, :, 1, :])
    cat = jnp.concatenate([h1, h2], axis=-1)
    seq, bsz = xp.shape[0], xp.shape[1]
    flat = cat.reshape(seq, bsz, -1)
    return jnp.einsum("sbf,lf->sbl", flat, Wbig, precision=hi) + bbig


if __name__ == "__main__":
    # Module defaults scaled down except latent (kept at the default 128, which
    # is also naturally lane-dense).
    bps_dim, cse_dim, latent_dim = 64, 16, 128
    bs, seqlen = 2, 8

    key = jax.random.PRNGKey(0)
    kx, k1, k2, k3, k4, k5, k6 = jax.random.split(key, 7)
    x = jax.random.normal(kx, (bs, seqlen, bps_dim, 2, 1 + cse_dim), jnp.float32)

    half = cse_dim // 2 - 1
    params = dict(
        Wc=jax.random.normal(k1, (1, 1), jnp.float32) * 0.5,
        bc=jax.random.normal(k2, (1,), jnp.float32) * 0.1,
        We=jax.random.normal(k3, (half, cse_dim), jnp.float32) * 0.1,
        be=jax.random.normal(k4, (half,), jnp.float32) * 0.1,
        Wbig=jax.random.normal(k5, (latent_dim, cse_dim * bps_dim),
                               jnp.float32) * 0.02,
        bbig=jax.random.normal(k6, (latent_dim,), jnp.float32) * 0.1,
    )

    # Parameter-load-time preprocessing (done once, outside the forward path).
    w_total, b_total = fold_params(params, bps_dim=bps_dim, cse_dim=cse_dim,
                                   latent_dim=latent_dim)

    fwd = jax.jit(input_process_cemap)
    out = jax.block_until_ready(fwd(x, w_total, b_total))

    assert out.shape == (seqlen, bs, latent_dim), out.shape
    ref = reference(x, params)
    err = float(jnp.max(jnp.abs(out - ref)))
    scale = float(jnp.max(jnp.abs(ref)))
    # Relative tolerance: operands are bf16 on the MXU with f32 accumulation.
    assert err <= 2e-2 * max(1.0, scale), f"max abs error {err} (ref scale {scale})"
    print("KERNEL_OK")
</pallas_src>

<mosaic_0001>
module attributes {stable_mosaic.version = 11 : i64} {
  func.func @_fused_rows_kernel(%arg0: i32, %arg1: memref<16x2176xf32, #tpu.memory_space<vmem>>, %arg2: memref<2176x128xbf16, #tpu.memory_space<vmem>>, %arg3: memref<1x128xf32, #tpu.memory_space<vmem>>, %arg4: memref<16x128xf32, #tpu.memory_space<vmem>>) attributes {dimension_semantics = [#tpu.dimension_semantics<parallel>], iteration_bounds = array<i64: 1>, scalar_prefetch = 0 : i64, scratch_operands = 0 : i64, tpu.core_type = #tpu.core_type<tc>, window_params = [{transform_indices = @transform_0, window_bounds = array<i64: 16, 2176>}, {pipeline_mode = #tpu.pipeline_mode<synchronous>, transform_indices = @transform_1, window_bounds = array<i64: 2176, 128>}, {pipeline_mode = #tpu.pipeline_mode<synchronous>, transform_indices = @transform_2, window_bounds = array<i64: 1, 128>}, {transform_indices = @transform_3, window_bounds = array<i64: 16, 128>}]} {
    %c0 = arith.constant 0 : index
    %c0_0 = arith.constant 0 : index
    %0 = vector.load %arg1[%c0, %c0_0] : memref<16x2176xf32, #tpu.memory_space<vmem>>, vector<16x2176xf32>
    %1 = arith.truncf %0 : vector<16x2176xf32> to vector<16x2176xbf16>
    %c0_1 = arith.constant 0 : index
    %c0_2 = arith.constant 0 : index
    %2 = vector.load %arg2[%c0_1, %c0_2] : memref<2176x128xbf16, #tpu.memory_space<vmem>>, vector<2176x128xbf16>
    %cst = arith.constant dense<0.000000e+00> : vector<16x128xf32>
    %3 = tpu.matmul %1, %2, %cst {dimension_numbers = #tpu.dot_dimension_numbers<[1], [0], [0], [1], [0, 0, 1, 1], [], []>} : vector<16x2176xbf16>, vector<2176x128xbf16>, vector<16x128xf32> -> vector<16x128xf32>
    %c0_3 = arith.constant 0 : index
    %c0_4 = arith.constant 0 : index
    %4 = vector.load %arg3[%c0_3, %c0_4] : memref<1x128xf32, #tpu.memory_space<vmem>>, vector<1x128xf32>
    %5 = vector.broadcast %4 : vector<1x128xf32> to vector<16x128xf32>
    %6 = arith.addf %3, %5 : vector<16x128xf32>
    %c0_5 = arith.constant 0 : index
    %c0_6 = arith.constant 0 : index
    %7 = vector.load %arg4[%c0_5, %c0_6] : memref<16x128xf32, #tpu.memory_space<vmem>>, vector<16x128xf32>
    tpu.vector_store %arg4[%c0_5, %c0_6], %6 {strides = array<i32>} : memref<16x128xf32, #tpu.memory_space<vmem>>, vector<16x128xf32>,
    return
  }
  func.func @transform_0(%arg0: i32) -> (i32, i32) {
    %c0_i32 = arith.constant 0 : i32
    %c0_i32_0 = arith.constant 0 : i32
    return %arg0, %c0_i32 : i32, i32
  }
  func.func @transform_1(%arg0: i32) -> (i32, i32) {
    %c0_i32 = arith.constant 0 : i32
    %c0_i32_0 = arith.constant 0 : i32
    %c0_i32_1 = arith.constant 0 : i32
    return %c0_i32, %c0_i32_0 : i32, i32
  }
  func.func @transform_2(%arg0: i32) -> (i32, i32) {
    %c0_i32 = arith.constant 0 : i32
    %c0_i32_0 = arith.constant 0 : i32
    %c0_i32_1 = arith.constant 0 : i32
    return %c0_i32, %c0_i32_0 : i32, i32
  }
  func.func @transform_3(%arg0: i32) -> (i32, i32) {
    %c0_i32 = arith.constant 0 : i32
    %c0_i32_0 = arith.constant 0 : i32
    return %arg0, %c0_i32 : i32, i32
  }
}

</mosaic_0001>

<bundles_post_ra>
// kernel: input_process_cemap.1
= control target key start
LH: loop header
LB: loop body
LE: loop exit
PB: predicated region body
PF: predicated region fallthrough
CT: control target
= control target key end

     0   :  { %vm2017_vm0 = vmmov 0   ;;  %s2557_s1 = inlined_call_operand.vmem [shape: bf16[2176,128], index: 1, kind: input, shape index: {}]   ;;  %s2558_s0 = inlined_call_operand.vmem [shape: f32[16,2176], index: 0, kind: input, shape index: {}]   ;;  %s2559_s2 = inlined_call_operand.vmem [shape: f32[1,128], index: 2, kind: input, shape index: {}]   ;;  %s2560_s3 = inlined_call_operand.vmem [shape: f32[16,128], index: 3, kind: output, shape index: {}]  }
   0x1   :  { %v1880_v0 = vld [vmem:[%s2557_s1 + $0x40] sm:$0xff]   ;;  %v1884_v4 = vld [vmem:[%s2557_s1 + $0x48] sm:$0xff]   ;;  %v1888_v8 = vld [vmem:[%s2557_s1 + $0x50] sm:$0xff]  }
   0x2   :  { %v1881_v1 = vld [vmem:[%s2557_s1] sm:$0xff]   ;;  %1673 = vmatprep.subr.bf16.mxu0 %v1880_v0  ;;  %v1885_v5 = vld [vmem:[%s2557_s1 + $0x8] sm:$0xff]   ;;  %v1889_v9 = vld [vmem:[%s2557_s1 + $0x10] sm:$0xff]  }
   0x3   :  { %v1882_v2 = vld [vmem:[%s2557_s1 + $0xc0] sm:$0xff]   ;;  %1674 = vmatpush3.bf16.msra.mxu0 %v1881_v1  ;;  %v1886_v6 = vld [vmem:[%s2557_s1 + $0xc8] sm:$0xff]   ;;  %v1890_v10 = vld [vmem:[%s2557_s1 + $0xd0] sm:$0xff]  }
   0x4   :  { %v1883_v3 = vld [vmem:[%s2557_s1 + $0x80] sm:$0xff]   ;;  %1695 = vmatprep.subr.bf16.mxu1 %v1882_v2  ;;  %1675 = vmatprep.subr.bf16.mxu0 %v1884_v4  ;;  %v1887_v7 = vld [vmem:[%s2557_s1 + $0x88] sm:$0xff]   ;;  %v1891_v11 = vld [vmem:[%s2557_s1 + $0x90] sm:$0xff]  }
   0x5   :  { %1696 = vmatpush3.bf16.msra.mxu1 %v1883_v3  ;;  %v1892_v12 = vld [vmem:[%s2557_s1 + $0x58] sm:$0xff]   ;;  %v1896_v16 = vld [vmem:[%s2557_s1 + $0x60] sm:$0xff]   ;;  %v1900_v20 = vld [vmem:[%s2557_s1 + $0x68] sm:$0xff]  }
   0x6   :  { %1697 = vmatprep.subr.bf16.mxu1 %v1886_v6  ;;  %v1893_v13 = vld [vmem:[%s2557_s1 + $0x18] sm:$0xff]   ;;  %v1897_v17 = vld [vmem:[%s2557_s1 + $0x20] sm:$0xff]   ;;  %v1901_v21 = vld [vmem:[%s2557_s1 + $0x28] sm:$0xff]  }
   0x7   :  { %1676 = vmatpush3.bf16.msra.mxu0 %v1885_v5  ;;  %v1894_v14 = vld [vmem:[%s2557_s1 + $0xd8] sm:$0xff]   ;;  %v1898_v18 = vld [vmem:[%s2557_s1 + $0xe0] sm:$0xff]   ;;  %v1902_v22 = vld [vmem:[%s2557_s1 + $0xe8] sm:$0xff]  }
   0x8   :  { %1677 = vmatprep.subr.bf16.mxu0 %v1888_v8  ;;  %v1895_v15 = vld [vmem:[%s2557_s1 + $0x98] sm:$0xff]   ;;  %v1899_v19 = vld [vmem:[%s2557_s1 + $0xa0] sm:$0xff]   ;;  %v1903_v23 = vld [vmem:[%s2557_s1 + $0xa8] sm:$0xff]  }
   0x9   :  { %1698 = vmatpush3.bf16.msra.mxu1 %v1887_v7  ;;  %v1904_v24 = vld [vmem:[%s2557_s1 + $0x70] sm:$0xff]   ;;  %v1908_v28 = vld [vmem:[%s2557_s1 + $0x78] sm:$0xff]   ;;  %v16_v31 = vld [vmem:[%s2558_s0 + $0x8] sm:$0xff] }
   0xa   :  { %1699 = vmatprep.subr.bf16.mxu1 %v1890_v10  ;;  %v1905_v25 = vld [vmem:[%s2557_s1 + $0x30] sm:$0xff]   ;;  %v1909_v29 = vld [vmem:[%s2557_s1 + $0x38] sm:$0xff]   ;;  %v15_v35 = vld [vmem:[%s2558_s0] sm:$0xff] }
   0xb   :  { %1678 = vmatpush3.bf16.msra.mxu0 %v1889_v9  ;;  %v1906_v26 = vld [vmem:[%s2557_s1 + $0xf0] sm:$0xff]   ;;  %v1910_v30 = vld [vmem:[%s2557_s1 + $0xf8] sm:$0xff]   ;;  %v32_v36 = vld [vmem:[%s2558_s0 + $0x88] sm:$0xff] }
   0xc   :  { %1679 = vmatprep.subr.bf16.mxu0 %v1892_v12  ;;  %v1907_v27 = vld [vmem:[%s2557_s1 + $0xb0] sm:$0xff]   ;;  %v1911_v34 = vld [vmem:[%s2557_s1 + $0xb8] sm:$0xff]   ;;  %v49_v37 = vpack.c.bf16 %v32_v36, %v15_v35  ;;  %v1912_v38 = vld [vmem:[%s2557_s1 + $0x140] sm:$0xff]  }
   0xd   :  { %1700 = vmatpush3.bf16.msra.mxu1 %v1891_v11  ;;  %v33_v32 = vld [vmem:[%s2558_s0 + $0x90] sm:$0xff]  ;;  %v18_v39 = vld [vmem:[%s2558_s0 + $0x18] sm:$0xff]  ;;  %v35_v40 = vld [vmem:[%s2558_s0 + $0xa0] sm:$0xff] }
   0xe   :  { %1701 = vmatprep.subr.bf16.mxu1 %v1894_v14  ;;  %v50_v33 = vpack.c.bf16 %v33_v32, %v16_v31  ;;  %v52_v41 = vpack.c.bf16 %v35_v40, %v18_v39  ;;  %v1913_v42 = vld [vmem:[%s2557_s1 + $0x100] sm:$0xff]   ;;  %v17_v43 = vld [vmem:[%s2558_s0 + $0x10] sm:$0xff]  ;;  %v34_v44 = vld [vmem:[%s2558_s0 + $0x98] sm:$0xff] }
   0xf   :  { %1680 = vmatpush3.bf16.msra.mxu0 %v1893_v13  ;;  %v51_v45 = vpack.c.bf16 %v34_v44, %v17_v43  ;;  %v1914_v46 = vld [vmem:[%s2557_s1 + $0x1c0] sm:$0xff]   ;;  %v1916_v48 = vld [vmem:[%s2557_s1 + $0x148] sm:$0xff]   ;;  %v1920_v52 = vld [vmem:[%s2557_s1 + $0x150] sm:$0xff]  }
  0x10   :  { %1681 = vmatprep.subr.bf16.mxu0 %v1896_v16  ;;  %1193 = vmatprep.mubr.bf16.mxu0 %v50_v33  ;;  %v1915_v47 = vld [vmem:[%s2557_s1 + $0x180] sm:$0xff]   ;;  %v1917_v49 = vld [vmem:[%s2557_s1 + $0x108] sm:$0xff]   ;;  %v1921_v53 = vld [vmem:[%s2557_s1 + $0x110] sm:$0xff]  }
  0x11   :  { %1702 = vmatpush3.bf16.msra.mxu1 %v1895_v15  ;;  %1234 = vmatprep.mubr.bf16.mxu1 %v52_v41  ;;  %v1918_v50 = vld [vmem:[%s2557_s1 + $0x1c8] sm:$0xff]   ;;  %v1922_v54 = vld [vmem:[%s2557_s1 + $0x1d0] sm:$0xff]   ;;  %v1924_v56 = vld [vmem:[%s2557_s1 + $0x158] sm:$0xff]  }
  0x12   :  { %1703 = vmatprep.subr.bf16.mxu1 %v1898_v18  ;;  %v1919_v51 = vld [vmem:[%s2557_s1 + $0x188] sm:$0xff]   ;;  %v1923_v55 = vld [vmem:[%s2557_s1 + $0x190] sm:$0xff]   ;;  %v1925_v57 = vld [vmem:[%s2557_s1 + $0x118] sm:$0xff]  }
  0x13   :  { %1682 = vmatpush3.bf16.msra.mxu0 %v1897_v17  ;;  %v1926_v58 = vld [vmem:[%s2557_s1 + $0x1d8] sm:$0xff]   ;;  %v1928_v60 = vld [vmem:[%s2557_s1 + $0x160] sm:$0xff]   ;;  %v1932_v0 = vld [vmem:[%s2557_s1 + $0x168] sm:$0xff]  }
  0x14   :  { %1683 = vmatprep.subr.bf16.mxu0 %v1900_v20  ;;  %v1927_v59 = vld [vmem:[%s2557_s1 + $0x198] sm:$0xff]   ;;  %v1929_v61 = vld [vmem:[%s2557_s1 + $0x120] sm:$0xff]   ;;  %v1933_v1 = vld [vmem:[%s2557_s1 + $0x128] sm:$0xff]  }
  0x15   :  { %1704 = vmatpush3.bf16.msra.mxu1 %v1899_v19  ;;  %v1930_v62 = vld [vmem:[%s2557_s1 + $0x1e0] sm:$0xff]   ;;  %v1934_v2 = vld [vmem:[%s2557_s1 + $0x1e8] sm:$0xff]   ;;  %v1936_v4 = vld [vmem:[%s2557_s1 + $0x170] sm:$0xff]  }
  0x16   :  { %1705 = vmatprep.subr.bf16.mxu1 %v1902_v22  ;;  %v1931_v63 = vld [vmem:[%s2557_s1 + $0x1a0] sm:$0xff]   ;;  %v1935_v3 = vld [vmem:[%s2557_s1 + $0x1a8] sm:$0xff]   ;;  %v1937_v5 = vld [vmem:[%s2557_s1 + $0x130] sm:$0xff]  }
  0x17   :  { %1684 = vmatpush3.bf16.msra.mxu0 %v1901_v21  ;;  %v1938_v6 = vld [vmem:[%s2557_s1 + $0x1f0] sm:$0xff]   ;;  %v1940_v8 = vld [vmem:[%s2557_s1 + $0x178] sm:$0xff]   ;;  %v20_v11 = vld [vmem:[%s2558_s0 + $0x28] sm:$0xff] }
  0x18   :  { %1685 = vmatprep.subr.bf16.mxu0 %v1904_v24  ;;  %v1939_v7 = vld [vmem:[%s2557_s1 + $0x1b0] sm:$0xff]   ;;  %v1941_v9 = vld [vmem:[%s2557_s1 + $0x138] sm:$0xff]   ;;  %v19_v15 = vld [vmem:[%s2558_s0 + $0x20] sm:$0xff] }
  0x19   :  { %1706 = vmatpush3.bf16.msra.mxu1 %v1903_v23  ;;  %v1942_v10 = vld [vmem:[%s2557_s1 + $0x1f8] sm:$0xff]   ;;  %v37_v12 = vld [vmem:[%s2558_s0 + $0xb0] sm:$0xff]  ;;  %v36_v16 = vld [vmem:[%s2558_s0 + $0xa8] sm:$0xff] }
  0x1a   :  { %1707 = vmatprep.subr.bf16.mxu1 %v1906_v26  ;;  %v54_v13 = vpack.c.bf16 %v37_v12, %v20_v11  ;;  %v1943_v14 = vld [vmem:[%s2557_s1 + $0x1b8] sm:$0xff]   ;;  %v53_v17 = vpack.c.bf16 %v36_v16, %v19_v15  ;;  %v1944_v18 = vld [vmem:[%s2557_s1 + $0x240] sm:$0xff]   ;;  %v21_v23 = vld [vmem:[%s2558_s0 + $0x30] sm:$0xff] }
  0x1b   :  { %1686 = vmatpush3.bf16.msra.mxu0 %v1905_v25  ;;  %v22_v19 = vld [vmem:[%s2558_s0 + $0x38] sm:$0xff]  ;;  %v39_v20 = vld [vmem:[%s2558_s0 + $0xc0] sm:$0xff]  ;;  %v1951_v31 = vld [vmem:[%s2557_s1 + $0x288] sm:$0xff]  }
  0x1c   :  { %1687 = vmatprep.subr.bf16.mxu0 %v1908_v28  ;;  %v56_v21 = vpack.c.bf16 %v39_v20, %v22_v19  ;;  %v1945_v22 = vld [vmem:[%s2557_s1 + $0x200] sm:$0xff]   ;;  %v38_v24 = vld [vmem:[%s2558_s0 + $0xb8] sm:$0xff]  ;;  %v1948_v28 = vld [vmem:[%s2557_s1 + $0x248] sm:$0xff]  }
  0x1d   :  { %1708 = vmatpush3.bf16.msra.mxu1 %v1907_v27  ;;  %v55_v25 = vpack.c.bf16 %v38_v24, %v21_v23  ;;  %v1946_v26 = vld [vmem:[%s2557_s1 + $0x2c0] sm:$0xff]   ;;  %v1952_v32 = vld [vmem:[%s2557_s1 + $0x250] sm:$0xff]   ;;  %v1956_v36 = vld [vmem:[%s2557_s1 + $0x258] sm:$0xff]  }
  0x1e   :  { %1709 = vmatprep.subr.bf16.mxu1 %v1910_v30  ;;  %v1947_v27 = vld [vmem:[%s2557_s1 + $0x280] sm:$0xff]   ;;  %v1950_v30 = vld [vmem:[%s2557_s1 + $0x2c8] sm:$0xff]   ;;  %v1953_v33 = vld [vmem:[%s2557_s1 + $0x210] sm:$0xff]  }
  0x1f   :  { %1688 = vmatpush3.bf16.msra.mxu0 %v1909_v29  ;;  %v1949_v29 = vld [vmem:[%s2557_s1 + $0x208] sm:$0xff]   ;;  %v1955_v35 = vld [vmem:[%s2557_s1 + $0x290] sm:$0xff]   ;;  %v1959_v39 = vld [vmem:[%s2557_s1 + $0x298] sm:$0xff]  }
  0x20   :  { %1717 = vmatprep.subr.bf16.mxu0 %v1912_v38  ;;  %v1958_v38 = vld [vmem:[%s2557_s1 + $0x2d8] sm:$0xff]   ;;  %v1960_v40 = vld [vmem:[%s2557_s1 + $0x260] sm:$0xff]   ;;  %v1964_v44 = vld [vmem:[%s2557_s1 + $0x268] sm:$0xff]  }
  0x21   :  { %1710 = vmatpush3.bf16.msra.mxu1 %v1911_v34  ;;  %v1954_v34 = vld [vmem:[%s2557_s1 + $0x2d0] sm:$0xff]   ;;  %v1961_v41 = vld [vmem:[%s2557_s1 + $0x220] sm:$0xff]   ;;  %v1983_v11 = vld [vmem:[%s2557_s1 + $0x388] sm:$0xff]  }
  0x22   :  { %1194 = vmatmul.mubr.bf16.vlgmr.msra.gmra.mrb[0].mxu0 %v49_v37  ;;  %1739 = vmatprep.subr.bf16.mxu1 %v1914_v46  ;;  %v1957_v37 = vld [vmem:[%s2557_s1 + $0x218] sm:$0xff]   ;;  %v1963_v43 = vld [vmem:[%s2557_s1 + $0x2a0] sm:$0xff]   ;;  %v1966_v46 = vld [vmem:[%s2557_s1 + $0x2e8] sm:$0xff]  }
  0x23   :  { %1718 = vmatpush3.bf16.msra.mxu0 %v1913_v42  ;;  %1275 = vmatprep.mubr.bf16.mxu0 %v54_v13  ;;  %v1962_v42 = vld [vmem:[%s2557_s1 + $0x2e0] sm:$0xff]   ;;  %v1984_v12 = vld [vmem:[%s2557_s1 + $0x350] sm:$0xff]   ;;  %v1988_v16 = vld [vmem:[%s2557_s1 + $0x358] sm:$0xff]  }
  0x24   :  { %1235 = vmatmul.mubr.bf16.vlgmr.msra.gmra.mrb[0].mxu1 %v51_v45  ;;  %1719 = vmatprep.subr.bf16.mxu0 %v1916_v48  ;;  %v1965_v45 = vld [vmem:[%s2557_s1 + $0x228] sm:$0xff]   ;;  %v1968_v48 = vld [vmem:[%s2557_s1 + $0x270] sm:$0xff]   ;;  %v1991_v19 = vld [vmem:[%s2557_s1 + $0x398] sm:$0xff]  }
  0x25   :  { %1740 = vmatpush3.bf16.msra.mxu1 %v1915_v47  ;;  %1316 = vmatprep.mubr.bf16.mxu1 %v56_v21  ;;  %v1967_v47 = vld [vmem:[%s2557_s1 + $0x2a8] sm:$0xff]   ;;  %v1985_v13 = vld [vmem:[%s2557_s1 + $0x310] sm:$0xff]   ;;  %v1992_v20 = vld [vmem:[%s2557_s1 + $0x360] sm:$0xff]  }
  0x26   :  { %1741 = vmatprep.subr.bf16.mxu1 %v1918_v50  ;;  %v1970_v50 = vld [vmem:[%s2557_s1 + $0x2f0] sm:$0xff]   ;;  %v1993_v21 = vld [vmem:[%s2557_s1 + $0x320] sm:$0xff]   ;;  %v1996_v24 = vld [vmem:[%s2557_s1 + $0x368] sm:$0xff]  }
  0x27   :  { %1720 = vmatpush3.bf16.msra.mxu0 %v1917_v49  ;;  %v1969_v49 = vld [vmem:[%s2557_s1 + $0x230] sm:$0xff]   ;;  %v1995_v23 = vld [vmem:[%s2557_s1 + $0x3a0] sm:$0xff]  }
  0x28   :  { %1721 = vmatprep.subr.bf16.mxu0 %v1920_v52  ;;  %v1972_v52 = vld [vmem:[%s2557_s1 + $0x278] sm:$0xff]   ;;  %v1987_v15 = vld [vmem:[%s2557_s1 + $0x390] sm:$0xff]  }
  0x29   :  { %1742 = vmatpush3.bf16.msra.mxu1 %v1919_v51  ;;  %v1971_v51 = vld [vmem:[%s2557_s1 + $0x2b0] sm:$0xff]  }
  0x2a   :  { %1743 = vmatprep.subr.bf16.mxu1 %v1922_v54  ;;  %v1974_v54 = vld [vmem:[%s2557_s1 + $0x2f8] sm:$0xff]  }
  0x2b   :  { %1722 = vmatpush3.bf16.msra.mxu0 %v1921_v53  ;;  %v1973_v53 = vld [vmem:[%s2557_s1 + $0x238] sm:$0xff]  }
  0x2c   :  { %1723 = vmatprep.subr.bf16.mxu0 %v1924_v56  ;;  %v41_v56 = vld [vmem:[%s2558_s0 + $0xd0] sm:$0xff] }
  0x2d   :  { %1744 = vmatpush3.bf16.msra.mxu1 %v1923_v55  ;;  %v24_v55 = vld [vmem:[%s2558_s0 + $0x48] sm:$0xff] }
  0x2e   :  { %1745 = vmatprep.subr.bf16.mxu1 %v1926_v58  ;;  %v1975_v58 = vld [vmem:[%s2557_s1 + $0x2b8] sm:$0xff]  }
  0x2f   :  { %1724 = vmatpush3.bf16.msra.mxu0 %v1925_v57  ;;  %v58_v57 = vpack.c.bf16 %v41_v56, %v24_v55  ;;  %v2014_v55 = vld [vmem:[%s2557_s1 + $0x430] sm:$0xff]   ;;  %v2015_v56 = vld [vmem:[%s2557_s1 + $0x438] sm:$0xff]  }
  0x30   :  { %1725 = vmatprep.subr.bf16.mxu0 %v1928_v60  ;;  %v40_v60 = vld [vmem:[%s2558_s0 + $0xc8] sm:$0xff] }
  0x31   :  { %1746 = vmatpush3.bf16.msra.mxu1 %v1927_v59  ;;  %v23_v59 = vld [vmem:[%s2558_s0 + $0x40] sm:$0xff] }
  0x32   :  { %1747 = vmatprep.subr.bf16.mxu1 %v1930_v62  ;;  %v1976_v62 = vld [vmem:[%s2557_s1 + $0x340] sm:$0xff]  }
  0x33   :  { %1726 = vmatpush3.bf16.msra.mxu0 %v1929_v61  ;;  %v57_v61 = vpack.c.bf16 %v40_v60, %v23_v59 }
  0x34   :  { %1727 = vmatprep.subr.bf16.mxu0 %v1932_v0  ;;  %v43_v0 = vld [vmem:[%s2558_s0 + $0xe0] sm:$0xff] }
  0x35   :  { %1748 = vmatpush3.bf16.msra.mxu1 %v1931_v63  ;;  %v26_v63 = vld [vmem:[%s2558_s0 + $0x58] sm:$0xff] }
  0x36   :  { %1749 = vmatprep.subr.bf16.mxu1 %v1934_v2  ;;  %v1977_v2 = vld [vmem:[%s2557_s1 + $0x300] sm:$0xff]  }
  0x37   :  { %1728 = vmatpush3.bf16.msra.mxu0 %v1933_v1  ;;  %v60_v1 = vpack.c.bf16 %v43_v0, %v26_v63 }
  0x38   :  { %1729 = vmatprep.subr.bf16.mxu0 %v1936_v4  ;;  %v42_v4 = vld [vmem:[%s2558_s0 + $0xd8] sm:$0xff] }
  0x39   :  { %1750 = vmatpush3.bf16.msra.mxu1 %v1935_v3  ;;  %v25_v3 = vld [vmem:[%s2558_s0 + $0x50] sm:$0xff] }
  0x3a   :  { %1751 = vmatprep.subr.bf16.mxu1 %v1938_v6  ;;  %v1978_v6 = vld [vmem:[%s2557_s1 + $0x3c0] sm:$0xff]  }
  0x3b   :  { %1730 = vmatpush3.bf16.msra.mxu0 %v1937_v5  ;;  %v59_v5 = vpack.c.bf16 %v42_v4, %v25_v3 }
  0x3c   :  { %1731 = vmatprep.subr.bf16.mxu0 %v1940_v8  ;;  %v1980_v8 = vld [vmem:[%s2557_s1 + $0x348] sm:$0xff]  }
  0x3d   :  { %1752 = vmatpush3.bf16.msra.mxu1 %v1939_v7  ;;  %v1979_v7 = vld [vmem:[%s2557_s1 + $0x380] sm:$0xff]  }
  0x3e   :  { %1753 = vmatprep.subr.bf16.mxu1 %v1942_v10  ;;  %v1982_v10 = vld [vmem:[%s2557_s1 + $0x3c8] sm:$0xff]  }
  0x3f   :  { %1732 = vmatpush3.bf16.msra.mxu0 %v1941_v9  ;;  %v1981_v9 = vld [vmem:[%s2557_s1 + $0x308] sm:$0xff]  }
  0x40   :  { %1761 = vmatprep.subr.bf16.mxu0 %v1944_v18  ;;  %v1990_v18 = vld [vmem:[%s2557_s1 + $0x3d8] sm:$0xff]  }
  0x41   :  { %1754 = vmatpush3.bf16.msra.mxu1 %v1943_v14  ;;  %v1986_v14 = vld [vmem:[%s2557_s1 + $0x3d0] sm:$0xff]  }
  0x42   :  { %1276 = vmatmul.mubr.bf16.vlgmr.msra.gmra.mrb[4].mxu0 %v53_v17  ;;  %1783 = vmatprep.subr.bf16.mxu1 %v1946_v26  ;;  %v1989_v17 = vld [vmem:[%s2557_s1 + $0x318] sm:$0xff]   ;;  %v1998_v26 = vld [vmem:[%s2557_s1 + $0x3e8] sm:$0xff]  }
  0x43   :  { %1762 = vmatpush3.bf16.msra.mxu0 %v1945_v22  ;;  %1357 = vmatprep.mubr.bf16.mxu0 %v58_v57  ;;  %v1994_v22 = vld [vmem:[%s2557_s1 + $0x3e0] sm:$0xff]  }
  0x44   :  { %1317 = vmatmul.mubr.bf16.vlgmr.msra.gmra.mrb[4].mxu1 %v55_v25  ;;  %1763 = vmatprep.subr.bf16.mxu0 %v1948_v28  ;;  %v1997_v25 = vld [vmem:[%s2557_s1 + $0x328] sm:$0xff]   ;;  %v2000_v28 = vld [vmem:[%s2557_s1 + $0x370] sm:$0xff]   ;;  %v31_v57 = vld [vmem:[%s2558_s0 + $0x80] sm:$0xff] }
  0x45   :  { %1784 = vmatpush3.bf16.msra.mxu1 %v1947_v27  ;;  %1398 = vmatprep.mubr.bf16.mxu1 %v60_v1  ;;  %v1999_v27 = vld [vmem:[%s2557_s1 + $0x3a8] sm:$0xff]  }
  0x46   :  { %1785 = vmatprep.subr.bf16.mxu1 %v1950_v30  ;;  %v2002_v30 = vld [vmem:[%s2557_s1 + $0x3f0] sm:$0xff]  }
  0x47   :  { %1764 = vmatpush3.bf16.msra.mxu0 %v1949_v29  ;;  %v2001_v29 = vld [vmem:[%s2557_s1 + $0x330] sm:$0xff]  }
  0x48   :  { %1765 = vmatprep.subr.bf16.mxu0 %v1952_v32  ;;  %v2004_v32 = vld [vmem:[%s2557_s1 + $0x378] sm:$0xff]  }
  0x49   :  { %1786 = vmatpush3.bf16.msra.mxu1 %v1951_v31  ;;  %v2003_v31 = vld [vmem:[%s2557_s1 + $0x3b0] sm:$0xff]  }
  0x4a   :  { %1787 = vmatprep.subr.bf16.mxu1 %v1954_v34  ;;  %v2006_v34 = vld [vmem:[%s2557_s1 + $0x3f8] sm:$0xff]  }
  0x4b   :  { %1766 = vmatpush3.bf16.msra.mxu0 %v1953_v33  ;;  %v2005_v33 = vld [vmem:[%s2557_s1 + $0x338] sm:$0xff]  }
  0x4c   :  { %1767 = vmatprep.subr.bf16.mxu0 %v1956_v36  ;;  %v45_v36 = vld [vmem:[%s2558_s0 + $0xf0] sm:$0xff] }
  0x4d   :  { %1788 = vmatpush3.bf16.msra.mxu1 %v1955_v35  ;;  %v28_v35 = vld [vmem:[%s2558_s0 + $0x68] sm:$0xff] }
  0x4e   :  { %1789 = vmatprep.subr.bf16.mxu1 %v1958_v38  ;;  %v2007_v38 = vld [vmem:[%s2557_s1 + $0x3b8] sm:$0xff]  }
  0x4f   :  { %1768 = vmatpush3.bf16.msra.mxu0 %v1957_v37  ;;  %v62_v37 = vpack.c.bf16 %v45_v36, %v28_v35 }
  0x50   :  { %1769 = vmatprep.subr.bf16.mxu0 %v1960_v40  ;;  %v2016_v40 = vmov 0.0  }
  0x51   :  { %1790 = vmatpush3.bf16.msra.mxu1 %v1959_v39  ;;  %v27_v39 = vld [vmem:[%s2558_s0 + $0x60] sm:$0xff] }
  0x52   :  { %1791 = vmatprep.subr.bf16.mxu1 %v1962_v42  ;;  %v30_v42 = vld [vmem:[%s2558_s0 + $0x78] sm:$0xff] }
  0x53   :  { %1770 = vmatpush3.bf16.msra.mxu0 %v1961_v41  ;;  %v44_v41 = vld [vmem:[%s2558_s0 + $0xe8] sm:$0xff] }
  0x54   :  { %1771 = vmatprep.subr.bf16.mxu0 %v1964_v44  ;;  %v61_v44 = vpack.c.bf16 %v44_v41, %v27_v39 }
  0x55   :  { %1792 = vmatpush3.bf16.msra.mxu1 %v1963_v43  ;;  %v47_v43 = vld [vmem:[%s2558_s0 + $0x100] sm:$0xff] }
  0x56   :  { %1793 = vmatprep.subr.bf16.mxu1 %v1966_v46  ;;  %v2008_v46 = vld [vmem:[%s2557_s1 + $0x400] sm:$0xff]  }
  0x57   :  { %1772 = vmatpush3.bf16.msra.mxu0 %v1965_v45  ;;  %v64_v45 = vpack.c.bf16 %v47_v43, %v30_v42 }
  0x58   :  { %1773 = vmatprep.subr.bf16.mxu0 %v1968_v48  ;;  %v46_v48 = vld [vmem:[%s2558_s0 + $0xf8] sm:$0xff] }
  0x59   :  { %1794 = vmatpush3.bf16.msra.mxu1 %v1967_v47  ;;  %v29_v47 = vld [vmem:[%s2558_s0 + $0x70] sm:$0xff] }
  0x5a   :  { %1795 = vmatprep.subr.bf16.mxu1 %v1970_v50  ;;  %v2009_v50 = vld [vmem:[%s2557_s1 + $0x408] sm:$0xff]  }
  0x5b   :  { %1774 = vmatpush3.bf16.msra.mxu0 %v1969_v49  ;;  %v63_v49 = vpack.c.bf16 %v46_v48, %v29_v47 }
  0x5c   :  { %1775 = vmatprep.subr.bf16.mxu0 %v1972_v52  ;;  %v2011_v52 = vld [vmem:[%s2557_s1 + $0x418] sm:$0xff]  }
  0x5d   :  { %1796 = vmatpush3.bf16.msra.mxu1 %v1971_v51  ;;  %v2010_v51 = vld [vmem:[%s2557_s1 + $0x410] sm:$0xff]  }
  0x5e   :  { %1797 = vmatprep.subr.bf16.mxu1 %v1974_v54  ;;  %v2013_v54 = vld [vmem:[%s2557_s1 + $0x428] sm:$0xff]  }
  0x5f   :  { %1776 = vmatpush3.bf16.msra.mxu0 %v1973_v53  ;;  %v2012_v53 = vld [vmem:[%s2557_s1 + $0x420] sm:$0xff]  }
  0x60   :  { %1805 = vmatprep.subr.bf16.mxu0 %v1976_v62 }
  0x61   :  { %1798 = vmatpush3.bf16.msra.mxu1 %v1975_v58  ;;  %v48_v58 = vld [vmem:[%s2558_s0 + $0x108] sm:$0xff] }
  0x62   :  { %1358 = vmatmul.mubr.bf16.vlgmr.msra.gmra.mrb[8].mxu0 %v57_v61  ;;  %1827 = vmatprep.subr.bf16.mxu1 %v1978_v6  ;;  %v65_v59 = vpack.c.bf16 %v48_v58, %v31_v57  ;;  %v1536_v61 = vld [vmem:[%s2559_s2] ss:$0 sm:$0xff] }
  0x63   :  { %1806 = vmatpush3.bf16.msra.mxu0 %v1977_v2  ;;  %1439 = vmatprep.mubr.bf16.mxu0 %v62_v37 }
  0x64   :  { %1399 = vmatmul.mubr.bf16.vlgmr.msra.gmra.mrb[8].mxu1 %v59_v5  ;;  %1807 = vmatprep.subr.bf16.mxu0 %v1980_v8 }
  0x65   :  { %1828 = vmatpush3.bf16.msra.mxu1 %v1979_v7  ;;  %1480 = vmatprep.mubr.bf16.mxu1 %v64_v45 }
  0x66   :  { %1829 = vmatprep.subr.bf16.mxu1 %v1982_v10 }
  0x67   :  { %1808 = vmatpush3.bf16.msra.mxu0 %v1981_v9 }
  0x68   :  { %1809 = vmatprep.subr.bf16.mxu0 %v1984_v12 }
  0x69   :  { %1830 = vmatpush3.bf16.msra.mxu1 %v1983_v11 }
  0x6a   :  { %1831 = vmatprep.subr.bf16.mxu1 %v1986_v14 }
  0x6b   :  { %1810 = vmatpush3.bf16.msra.mxu0 %v1985_v13 }
  0x6c   :  { %1811 = vmatprep.subr.bf16.mxu0 %v1988_v16 }
  0x6d   :  { %1832 = vmatpush3.bf16.msra.mxu1 %v1987_v15 }
  0x6e   :  { %1833 = vmatprep.subr.bf16.mxu1 %v1990_v18 }
  0x6f   :  { %1812 = vmatpush3.bf16.msra.mxu0 %v1989_v17 }
  0x70   :  { %1813 = vmatprep.subr.bf16.mxu0 %v1992_v20 }
  0x71   :  { %1834 = vmatpush3.bf16.msra.mxu1 %v1991_v19 }
  0x72   :  { %1835 = vmatprep.subr.bf16.mxu1 %v1994_v22 }
  0x73   :  { %1814 = vmatpush3.bf16.msra.mxu0 %v1993_v21 }
  0x74   :  { %1815 = vmatprep.subr.bf16.mxu0 %v1996_v24 }
  0x75   :  { %1836 = vmatpush3.bf16.msra.mxu1 %v1995_v23 }
  0x76   :  { %1837 = vmatprep.subr.bf16.mxu1 %v1998_v26 }
  0x77   :  { %1816 = vmatpush3.bf16.msra.mxu0 %v1997_v25 }
  0x78   :  { %1817 = vmatprep.subr.bf16.mxu0 %v2000_v28 }
  0x79   :  { %1838 = vmatpush3.bf16.msra.mxu1 %v1999_v27 }
  0x7a   :  { %1839 = vmatprep.subr.bf16.mxu1 %v2002_v30 }
  0x7b   :  { %1818 = vmatpush3.bf16.msra.mxu0 %v2001_v29 }
  0x7c   :  { %1819 = vmatprep.subr.bf16.mxu0 %v2004_v32 }
  0x7d   :  { %1840 = vmatpush3.bf16.msra.mxu1 %v2003_v31 }
  0x7e   :  { %1841 = vmatprep.subr.bf16.mxu1 %v2006_v34 }
  0x7f   :  { %1820 = vmatpush3.bf16.msra.mxu0 %v2005_v33 }
  0x80   :  { %1858 = vmatprep.subr.bf16.mxu0 %v2016_v40 }
  0x81   :  { %1842 = vmatpush3.bf16.msra.mxu1 %v2007_v38 }
  0x82   :  { %1440 = vmatmul.mubr.bf16.vlgmr.msra.gmra.mrb[12].mxu0 %v61_v44 }
  0x83   :  { %1859 = vmatpush3.bf16.msra.mxu0 %v2008_v46  ;;  %1874 = vmatprep.mubr.msk.bf16.mxu0 %vm2017_vm0, %v2016_v40 }
  0x84   :  { %1481 = vmatmul.mubr.bf16.vlgmr.msra.gmra.mrb[12].mxu1 %v63_v49  ;;  %1860 = vmatprep.subr.bf16.mxu0 %v2016_v40 }
  0x87   :  { %1861 = vmatpush3.bf16.msra.mxu0 %v2009_v50 }
  0x88   :  { %1862 = vmatprep.subr.bf16.mxu0 %v2016_v40 }
  0x8b   :  { %1863 = vmatpush3.bf16.msra.mxu0 %v2010_v51 }
  0x8c   :  { %1864 = vmatprep.subr.bf16.mxu0 %v2016_v40 }
  0x8f   :  { %1865 = vmatpush3.bf16.msra.mxu0 %v2011_v52 }
  0x90   :  { %1866 = vmatprep.subr.bf16.mxu0 %v2016_v40 }
  0x93   :  { %1867 = vmatpush3.bf16.msra.mxu0 %v2012_v53 }
  0x94   :  { %1868 = vmatprep.subr.bf16.mxu0 %v2016_v40 }
  0x97   :  { %1869 = vmatpush3.bf16.msra.mxu0 %v2013_v54 }
  0x98   :  { %1870 = vmatprep.subr.bf16.mxu0 %v2016_v40 }
  0x9b   :  { %1871 = vmatpush3.bf16.msra.mxu0 %v2014_v55 }
  0x9c   :  { %1872 = vmatprep.subr.bf16.mxu0 %v2016_v40 }
  0x9f   :  { %1873 = vmatpush3.bf16.msra.mxu0 %v2015_v56 }
  0xa2   :  { %1875 = vmatmul.mubr.bf16.vlgmr.msra.gmra.mrb[16].mxu0 %v65_v59 }
  0xf5   :  { %v1689_v60 = vpop.f32.mrb[0].mxu0 }
  0xf6   :  { %v1690_v62 = vpop.f32.mrb[1].mxu0 }
  0xf7   :  { %v1691_v63 = vadd.f32 %v1690_v62, %v1689_v60  ;;  %v1692_v0 = vpop.f32.mrb[2].mxu0  ;;  %v1711_v1 = vpop.f32.mrb[0].mxu1 }
  0xf8   :  { %v1693_v2 = vpop.f32.mrb[3].mxu0  ;;  %v1712_v5 = vpop.f32.mrb[1].mxu1 }
  0xf9   :  { %v1196_v3 = vadd.f32 %v1691_v63, %v1536_v61  ;;  %v1694_v4 = vadd.f32 %v1693_v2, %v1692_v0  ;;  %v1713_v6 = vadd.f32 %v1712_v5, %v1711_v1  ;;  %v1714_v7 = vpop.f32.mrb[2].mxu1 }
  0xfa   :  { %v1715_v9 = vpop.f32.mrb[3].mxu1 }
  0xfb   :  { %v1199_v8 = vadd.f32 %v1694_v4, %v1536_v61  ;;  %v1237_v10 = vadd.f32 %v1713_v6, %v1196_v3  ;;  %v1716_v11 = vadd.f32 %v1715_v9, %v1714_v7 }
  0xfd   :  { %v1240_v12 = vadd.f32 %v1716_v11, %v1199_v8 }
 0x115   :  { %v1733_v13 = vpop.f32.mrb[4].mxu0 }
 0x116   :  { %v1734_v14 = vpop.f32.mrb[5].mxu0 }
 0x117   :  { %v1735_v15 = vadd.f32 %v1734_v14, %v1733_v13  ;;  %v1736_v16 = vpop.f32.mrb[6].mxu0  ;;  %v1755_v19 = vpop.f32.mrb[4].mxu1 }
 0x118   :  { %v1737_v17 = vpop.f32.mrb[7].mxu0  ;;  %v1756_v21 = vpop.f32.mrb[5].mxu1 }
 0x119   :  { %v1278_v18 = vadd.f32 %v1735_v15, %v1237_v10  ;;  %v1738_v20 = vadd.f32 %v1737_v17, %v1736_v16  ;;  %v1757_v23 = vadd.f32 %v1756_v21, %v1755_v19  ;;  %v1758_v24 = vpop.f32.mrb[6].mxu1 }
 0x11a   :  { %v1759_v25 = vpop.f32.mrb[7].mxu1 }
 0x11b   :  { %v1281_v22 = vadd.f32 %v1738_v20, %v1240_v12  ;;  %v1319_v26 = vadd.f32 %v1757_v23, %v1278_v18  ;;  %v1760_v27 = vadd.f32 %v1759_v25, %v1758_v24 }
 0x11d   :  { %v1322_v28 = vadd.f32 %v1760_v27, %v1281_v22 }
 0x135   :  { %v1777_v29 = vpop.f32.mrb[8].mxu0 }
 0x136   :  { %v1778_v30 = vpop.f32.mrb[9].mxu0 }
 0x137   :  { %v1779_v31 = vadd.f32 %v1778_v30, %v1777_v29  ;;  %v1780_v32 = vpop.f32.mrb[10].mxu0  ;;  %v1799_v33 = vpop.f32.mrb[8].mxu1 }
 0x138   :  { %v1781_v34 = vpop.f32.mrb[11].mxu0  ;;  %v1800_v37 = vpop.f32.mrb[9].mxu1 }
 0x139   :  { %v1360_v35 = vadd.f32 %v1779_v31, %v1319_v26  ;;  %v1782_v36 = vadd.f32 %v1781_v34, %v1780_v32  ;;  %v1801_v38 = vadd.f32 %v1800_v37, %v1799_v33  ;;  %v1802_v39 = vpop.f32.mrb[10].mxu1 }
 0x13a   :  { %v1803_v41 = vpop.f32.mrb[11].mxu1 }
 0x13b   :  { %v1363_v40 = vadd.f32 %v1782_v36, %v1322_v28  ;;  %v1401_v42 = vadd.f32 %v1801_v38, %v1360_v35  ;;  %v1804_v43 = vadd.f32 %v1803_v41, %v1802_v39 }
 0x13d   :  { %v1404_v44 = vadd.f32 %v1804_v43, %v1363_v40 }
 0x155   :  { %v1821_v45 = vpop.f32.mrb[12].mxu0 }
 0x156   :  { %v1822_v46 = vpop.f32.mrb[13].mxu0 }
 0x157   :  { %v1823_v47 = vadd.f32 %v1822_v46, %v1821_v45  ;;  %v1824_v48 = vpop.f32.mrb[14].mxu0  ;;  %v1843_v49 = vpop.f32.mrb[12].mxu1 }
 0x158   :  { %v1825_v50 = vpop.f32.mrb[15].mxu0  ;;  %v1844_v51 = vpop.f32.mrb[13].mxu1 }
 0x159   :  { %v1442_v52 = vadd.f32 %v1823_v47, %v1401_v42  ;;  %v1826_v53 = vadd.f32 %v1825_v50, %v1824_v48  ;;  %v1845_v54 = vadd.f32 %v1844_v51, %v1843_v49  ;;  %v1846_v55 = vpop.f32.mrb[14].mxu1 }
 0x15a   :  { %v1847_v56 = vpop.f32.mrb[15].mxu1 }
 0x15b   :  { %v1445_v57 = vadd.f32 %v1826_v53, %v1404_v44  ;;  %v1848_v58 = vadd.f32 %v1847_v56, %v1846_v55  ;;  %v1483_v59 = vadd.f32 %v1845_v54, %v1442_v52 }
 0x15d   :  { %v1486_v60 = vadd.f32 %v1848_v58, %v1445_v57 }
 0x175   :  { %v1523_v61 = vpop.f32.mrb[16].mxu0 }
 0x176   :  { %v1524_v62 = vadd.f32 %v1523_v61, %v1483_v59  ;;  %v1876_v63 = vpop.f32.mrb[17].mxu0 }
 0x177   :  { %v1526_v0 = vpop.f32.mrb[18].mxu0 }
 0x178   :  { %1530 = vst [vmem:[%s2560_s3] sm:$0xff] %v1524_v62  ;;  %v1527_v1 = vadd.f32 %v1526_v0, %v1486_v60  ;;  %v1877_v2 = vpop.f32.mrb[19].mxu0 }
 0x17a   :  { %1531 = vst [vmem:[%s2560_s3 + $0x8] sm:$0xff] %v1527_v1 }

</bundles_post_ra>
